<compile_context>
chip_gen: v7x
topology: tpu7x:2x2x1
jax: 0.10.0
libtpu: 0.0.40
codegen_flags: <defaults>
</compile_context>

<pallas_src>
import math
import functools

import jax
import jax.numpy as jnp
from jax import lax
from jax.experimental import pallas as pl
from jax.experimental.pallas import tpu as pltpu

INF_F = float(2**31 - 1)                 # torch.iinfo(torch.int).max (as f32 sentinel)
BBOX_XFORM_CLIP = math.log(1000.0 / 16)  # FCOSBoxCoder default
BOX_WEIGHTS = (1.0, 1.0, 1.0, 1.0)       # FCOSBoxCoder(weights=(1,1,1,1))


def _round_up(n, m):
    return ((n + m - 1) // m) * m


def _pad_cols(a, total):
    pad = total - a.shape[-1]
    if pad == 0:
        return a
    cfg = [(0, 0)] * (a.ndim - 1) + [(0, pad)]
    return jnp.pad(a, cfg)


def _pick_tile(p, tile_p):
    """Keep lane tiles a multiple of 256 (full MXU pushes on v6e/v7x), but never
    pad a small P out to a huge tile."""
    return max(256, min(tile_p, _round_up(p, 256)))


# ----------------------------------------------------------------------------
# Kernel 1 (fused forward): backbone 1x1-proj + packed FCOS head +
#           FCOSBoxCoder.decode_single + dense sigmoid scoring.
# All tensors are in the transposed lane-dense layout (channels on sublanes,
# points on lanes).  Two packed full-sublane output slabs.
# ----------------------------------------------------------------------------
def _fused_fwd_kernel(x_ref, wf_ref, bf_ref, wh_ref, bh_ref, pts_ref,
                      head_ref, det_ref,
                      *, num_classes, img_h, img_w, emit_scores):
    x = x_ref[0].astype(jnp.float32)           # (Cin, TP)
    wf = wf_ref[...]                           # (C, Cin)
    cin = x.shape[0]

    # backbone 1x1-conv projection as Cin broadcast FMAs on the VPU (Cin tiny;
    # a K=Cin matmul would waste a full MXU pass and force a relayout).
    y = wf[:, 0:1] * x[0:1, :]
    for i in range(1, cin):
        y = y + wf[:, i:i + 1] * x[i:i + 1, :]
    feat = jnp.maximum(y + bf_ref[...], 0.0)   # (C, TP), stays in VMEM/vregs

    # packed FCOS head (cls|reg|ctr|zero-pad rows) as ONE matmul.  bf16 operands
    # hit the native single-pass path on the 2x256^2 MXUs (v6e/v7x); accumulation
    # stays f32 via preferred_element_type.
    head = jnp.dot(wh_ref[...].astype(jnp.bfloat16), feat.astype(jnp.bfloat16),
                   preferred_element_type=jnp.float32) + bh_ref[...]   # (Kh_pad, TP)
    head_ref[0] = head.astype(head_ref.dtype)   # one unmasked (8k, TP) store

    k = num_classes
    cls = head[0:k, :]                          # (K, TP)
    reg = head[k:k + 4, :]                      # (4, TP) ltrb codes
    ctr = head[k + 4:k + 5, :]                  # (1, TP)

    # FCOSBoxCoder.decode_single, built row-by-row from the (2, TP) points block.
    # (Scalar * vector FMAs only — no captured constant arrays.)
    px = pts_ref[0:1, :]
    py = pts_ref[1:2, :]
    reg_e = jnp.exp(jnp.minimum(reg, BBOX_XFORM_CLIP))
    wl, wt, wr, wb = BOX_WEIGHTS
    x1 = px - (img_w / wl) * reg_e[0:1, :]
    y1 = py - (img_h / wt) * reg_e[1:2, :]
    x2 = px + (img_w / wr) * reg_e[2:3, :]
    y2 = py + (img_h / wb) * reg_e[3:4, :]
    det = jnp.concatenate([x1, y1, x2, y2], axis=0)             # (4, TP)

    if emit_scores:
        # dense postprocess scoring: sigmoid(cls) * sigmoid(centerness)
        # (EUP sigmoids hide under the matmul / store work).
        scores = jax.nn.sigmoid(cls) * jax.nn.sigmoid(ctr)       # (K, TP)
        det = jnp.concatenate([det, scores], axis=0)

    pad_rows = det_ref.shape[1] - det.shape[0]
    if pad_rows:
        det = jnp.concatenate(
            [det, jnp.zeros((pad_rows, det.shape[1]), det.dtype)], axis=0)
    det_ref[0] = det.astype(det_ref.dtype)       # second packed full-sublane store


def fused_forward(x_t, w_feat, b_feat, w_cls, b_cls, w_reg, b_reg, w_ctr, b_ctr,
                  points, image_hw, *, tile_p=1024, emit_scores=True,
                  out_dtype=jnp.float32):
    """x_t: (B, Cin, P) channel-major pooled backbone input (f32 or bf16).

    Returns dict with point-major (PyTorch-convention) tensors:
      cls_logits (B,P,K), bbox_regression (B,P,4), centerness (B,P,1),
      boxes (B,P,4) decoded x1y1x2y2 and, if emit_scores, scores (B,P,K).
    For the memory-bound production path, feed bf16 x_t and out_dtype=bf16
    (keep box decode consumers aware of the precision drop).
    """
    B, Cin, P = x_t.shape
    C = w_feat.shape[1]
    K = w_cls.shape[1]
    Kh = K + 5
    Kh_pad = _round_up(Kh, 8)                    # full-sublane head slab
    det_rows = _round_up(4 + (K if emit_scores else 0), 8)
    img_h, img_w = image_hw

    tile_p = _pick_tile(P, tile_p)
    P_pad = _round_up(P, tile_p)
    x_pad = _pad_cols(x_t, P_pad)                                     # (B, Cin, Ppad)

    # packed / transposed / zero-padded parameters
    w_feat_t = jnp.transpose(w_feat)                                  # (C, Cin)
    b_feat_c = jnp.transpose(b_feat)                                  # (C, 1)
    w_head_t = jnp.transpose(jnp.concatenate([w_cls, w_reg, w_ctr], axis=1))  # (Kh, C)
    b_head_c = jnp.transpose(jnp.concatenate([b_cls, b_reg, b_ctr], axis=1))  # (Kh, 1)
    w_head_t = jnp.pad(w_head_t, ((0, Kh_pad - Kh), (0, 0)))          # (Kh_pad, C)
    b_head_c = jnp.pad(b_head_c, ((0, Kh_pad - Kh), (0, 0)))          # (Kh_pad, 1)

    pts_t = _pad_cols(jnp.transpose(points), P_pad)                   # (2, Ppad)

    grid = (B, P_pad // tile_p)
    kern = functools.partial(_fused_fwd_kernel, num_classes=K,
                             img_h=float(img_h), img_w=float(img_w),
                             emit_scores=emit_scores)
    # Same tile on v5e/v6e/v7x: per-block VMEM is KBs, far under the scoped
    # default on every generation; the B grid axis keeps >=2 parallel steps for
    # v7x's two TensorCores.
    head_t, det_t = pl.pallas_call(
        kern,
        out_shape=(
            jax.ShapeDtypeStruct((B, Kh_pad, P_pad), out_dtype),
            jax.ShapeDtypeStruct((B, det_rows, P_pad), out_dtype),
        ),
        grid=grid,
        in_specs=[
            pl.BlockSpec((1, Cin, tile_p), lambda b, t: (b, 0, t)),
            pl.BlockSpec((C, Cin), lambda b, t: (0, 0)),
            pl.BlockSpec((C, 1), lambda b, t: (0, 0)),
            pl.BlockSpec((Kh_pad, C), lambda b, t: (0, 0)),
            pl.BlockSpec((Kh_pad, 1), lambda b, t: (0, 0)),
            pl.BlockSpec((2, tile_p), lambda b, t: (0, t)),
        ],
        out_specs=(
            pl.BlockSpec((1, Kh_pad, tile_p), lambda b, t: (b, 0, t)),
            pl.BlockSpec((1, det_rows, tile_p), lambda b, t: (b, 0, t)),
        ),
        compiler_params=pltpu.CompilerParams(
            dimension_semantics=("parallel", "parallel")),
    )(x_pad, w_feat_t, b_feat_c, w_head_t, b_head_c, pts_t)

    # transpose back to point-major once (production consumers that can stay
    # channel-major should take head_t/det_t slabs directly and skip this copy).
    to_pm = lambda a: jnp.swapaxes(a[:, :, :P], 1, 2)
    outs = {
        "cls_logits": to_pm(head_t[:, 0:K]),
        "bbox_regression": to_pm(head_t[:, K:K + 4]),
        "centerness": to_pm(head_t[:, K + 4:K + 5]),
        "boxes": to_pm(det_t[:, 0:4]),
    }
    if emit_scores:
        outs["scores"] = to_pm(det_t[:, 4:4 + K])
    # TODO(synk): inference-only variant could also drop the cls rows from the
    # head slab (labels come from top-k indices, not logits) to halve writeback.
    return outs


# ----------------------------------------------------------------------------
# Kernel 2: compute_loss point<->gt matching -> matched_idxs (lane-dense).
# gt boxes live in SMEM (scalar splats); per-gt cost is streamed so only ~4
# vregs per lane-tile stay live regardless of G.
# ----------------------------------------------------------------------------
def _match_kernel(pts_ref, lim_ref, gt_ref, out_ref):
    b = pl.program_id(0)
    g = gt_ref.shape[1] // 4

    px = pts_ref[0:1, :]                       # (1, TP)
    py = pts_ref[1:2, :]
    lo = lim_ref[0:1, :]
    hi = lim_ref[1:2, :]

    def gt_cost(gi):
        # scalar SMEM reads splat into VPU ops for free
        x1 = gt_ref[b, gi * 4 + 0]
        y1 = gt_ref[b, gi * 4 + 1]
        x2 = gt_ref[b, gi * 4 + 2]
        y2 = gt_ref[b, gi * 4 + 3]
        left = px - x1
        top = py - y1
        right = x2 - px
        bottom = y2 - py
        mn = jnp.minimum(jnp.minimum(left, top), jnp.minimum(right, bottom))
        mx = jnp.maximum(jnp.maximum(left, top), jnp.maximum(right, bottom))
        matched = (mn > 0.0) & (mx > lo) & (mx < hi)            # (1, TP)
        area = (x2 - x1) * (y2 - y1)                            # scalar
        cost = jnp.where(matched, area, INF_F)                  # (1, TP)
        return cost, matched

    cost0, m0 = gt_cost(0)
    best_cost = cost0
    best_idx = jnp.zeros_like(px, dtype=jnp.int32)
    any_match = m0

    def step(gi, carry):
        best_cost, best_idx, any_match = carry
        cg, mg = gt_cost(gi)
        take = cg < best_cost              # strict '<' keeps the earliest index
        best_idx = jnp.where(take, gi, best_idx)
        best_cost = jnp.minimum(best_cost, cg)
        any_match = any_match | mg
        return best_cost, best_idx, any_match

    if g <= 8:
        for gi in range(1, g):             # short static unroll for small G
            best_cost, best_idx, any_match = step(gi, (best_cost, best_idx, any_match))
    else:
        best_cost, best_idx, any_match = lax.fori_loop(
            1, g, step, (best_cost, best_idx, any_match), unroll=4)

    out_ref[0] = jnp.where(any_match, best_idx, -1).astype(jnp.int32)  # (1, TP)


def match_points(points, object_limits, gt_boxes, *, tile_p=1024):
    """points (P,2), object_limits (P,2), gt_boxes (B,G,4) -> matched_idxs (B,P) int32."""
    P = points.shape[0]
    B, G, _ = gt_boxes.shape
    tile_p = _pick_tile(P, tile_p)
    P_pad = _round_up(P, tile_p)
    pts_t = _pad_cols(jnp.transpose(points), P_pad)          # (2, Ppad)
    lim_t = _pad_cols(jnp.transpose(object_limits), P_pad)   # (2, Ppad)
    gt_flat = gt_boxes.reshape(B, G * 4).astype(jnp.float32)  # flat, long axis last (SMEM friendly)

    out = pl.pallas_call(
        _match_kernel,
        out_shape=jax.ShapeDtypeStruct((B, 1, P_pad), jnp.int32),
        grid=(B, P_pad // tile_p),
        in_specs=[
            pl.BlockSpec((2, tile_p), lambda b, t: (0, t)),
            pl.BlockSpec((2, tile_p), lambda b, t: (0, t)),
            pl.BlockSpec(memory_space=pltpu.MemorySpace.SMEM),   # whole gt table in SMEM
        ],
        out_specs=pl.BlockSpec((1, 1, tile_p), lambda b, t: (b, 0, t)),
        compiler_params=pltpu.CompilerParams(
            dimension_semantics=("parallel", "parallel")),
    )(pts_t, lim_t, gt_flat)
    return out[:, 0, :P]


# ----------------------------------------------------------------------------
# Plain-JAX glue: reference_points / object size limits (pure index arithmetic)
# ----------------------------------------------------------------------------
def reference_points(image_hw, feat_hws):
    img_h, img_w = image_hw
    pts = []
    for (H, W) in feat_hws:
        sh, sw = img_h // H, img_w // W
        cx = jnp.arange(W, dtype=jnp.float32) * sw + sw // 2
        cy = jnp.arange(H, dtype=jnp.float32) * sh + sh // 2
        cyg, cxg = jnp.meshgrid(cy, cx, indexing="ij")
        pts.append(jnp.stack([cxg, cyg], axis=-1).reshape(-1, 2))
    return jnp.concatenate(pts, axis=0)                   # (P, 2)


def object_size_limits(feats_shapes):
    sizes = [[-1.0, 64.0], [64.0, 128.0], [128.0, 256.0], [256.0, 512.0], [512.0, INF_F]]
    lims = []
    for sz, hw in zip(sizes, feats_shapes):
        lims.append(jnp.broadcast_to(jnp.asarray(sz, jnp.float32)[None, :], (hw, 2)))
    return jnp.concatenate(lims, axis=0)                  # (P, 2)


# ----------------------------------------------------------------------------
# Pure-JAX references for correctness checks (no Pallas)
# ----------------------------------------------------------------------------
def _match_ref_one(points, limits, boxes):
    px, py = points[:, 0:1], points[:, 1:2]
    x1, y1, x2, y2 = boxes[:, 0], boxes[:, 1], boxes[:, 2], boxes[:, 3]
    reg = jnp.stack([px - x1[None], py - y1[None], y2[None] - py, x2[None] - px], -1)
    within = jnp.min(reg, -1) > 0
    mx = jnp.max(reg, -1)
    rng = (mx > limits[:, 0:1]) & (mx < limits[:, 1:2])
    matched = (within & rng).astype(jnp.int32)
    areas = (x2 - x1) * (y2 - y1)
    cost = matched * areas[None] + (1 - matched) * INF_F
    idxs = jnp.argmin(cost, axis=1).astype(jnp.int32)
    return jnp.where(jnp.sum(matched, 1) > 0, idxs, -1)


def _decode_ref(reg, points, image_shape):
    h, w = image_shape
    reg = jnp.exp(jnp.minimum(reg, BBOX_XFORM_CLIP))
    x, y = points[:, 0:1], points[:, 1:2]
    return jnp.concatenate(
        [x - reg[..., 0:1] * w, y - reg[..., 1:2] * h,
         x + reg[..., 2:3] * w, y + reg[..., 3:4] * h], axis=-1)


# ----------------------------------------------------------------------------
if __name__ == "__main__":
    B = 2
    IMG_H = IMG_W = 64
    CIN = 3
    C = 16
    NUM_CLASSES = 1          # person search: single foreground class
    STRIDES = (8, 16)        # 2 FPN levels (zip with object_sizes_of_interest truncates)
    G = 3                    # gt boxes per image
    TILE_P = 1024            # production tile (sweep 1024-4096); _pick_tile clamps
                             # it to 256 lanes for this tiny demo P.

    feat_hw = [(IMG_H // s, IMG_W // s) for s in STRIDES]          # [(8,8), (4,4)]
    feats_shapes = [h * w for h, w in feat_hw]                     # [64, 16]
    P = sum(feats_shapes)                                          # 80

    key = jax.random.PRNGKey(0)
    keys = jax.random.split(key, 9)
    images = jax.random.normal(keys[0], (B, CIN, IMG_H, IMG_W), jnp.float32)   # NCHW input

    # deterministic synthetic parameters (backbone projection + 3 head branches)
    w_feat = jax.random.normal(keys[1], (CIN, C), jnp.float32) * 0.2
    b_feat = jax.random.normal(keys[2], (1, C), jnp.float32) * 0.1
    w_cls = jax.random.normal(keys[3], (C, NUM_CLASSES), jnp.float32) * 0.2
    b_cls = jnp.full((1, NUM_CLASSES), -2.0, jnp.float32)
    w_reg = jax.random.normal(keys[4], (C, 4), jnp.float32) * 0.2
    b_reg = jnp.full((1, 4), -1.0, jnp.float32)
    w_ctr = jax.random.normal(keys[5], (C, 1), jnp.float32) * 0.2
    b_ctr = jnp.zeros((1, 1), jnp.float32)

    # TODO(synk): GeneralizedRCNNTransform (resize/normalize/batching) is an injected
    # dependency and is skipped; inputs are assumed already transformed.

    # "backbone": strided average pooling per level (glue), kept channel-major so the
    # fused kernel consumes a lane-dense (B, Cin, P) slab directly.
    feats_ch = []
    for (H, W), s in zip(feat_hw, STRIDES):
        pooled = images.reshape(B, CIN, H, s, W, s).mean(axis=(3, 5))     # (B, Cin, H, W)
        feats_ch.append(pooled.reshape(B, CIN, H * W))
    x_t = jnp.concatenate(feats_ch, axis=-1)                              # (B, Cin, P)

    # reference points + object-size-of-interest limits (index arithmetic glue)
    points = reference_points((IMG_H, IMG_W), feat_hw)                    # (P, 2)
    limits = object_size_limits(feats_shapes)                             # (P, 2)

    # fused Pallas forward: projection + packed head + decode + dense scoring
    outs = fused_forward(x_t, w_feat, b_feat, w_cls, b_cls, w_reg, b_reg,
                         w_ctr, b_ctr, points, (IMG_H, IMG_W), tile_p=TILE_P)
    cls_logits = outs["cls_logits"]
    bbox_regression = outs["bbox_regression"]
    centerness = outs["centerness"]
    boxes = outs["boxes"]
    scores = outs["scores"]

    # synthetic targets (deterministic)
    gt_boxes = jnp.asarray(
        [[[4.0, 4.0, 40.0, 40.0], [10.0, 12.0, 30.0, 50.0], [2.0, 2.0, 62.0, 62.0]],
         [[8.0, 8.0, 20.0, 24.0], [16.0, 16.0, 48.0, 48.0], [0.0, 0.0, 63.0, 63.0]]],
        jnp.float32)                                                      # (B, G, 4)

    # compute_loss matching (Pallas lane-dense kernel, gt table in SMEM)
    matched_idxs = match_points(points, limits, gt_boxes, tile_p=TILE_P)  # (B, P) int32
    # TODO(synk): fcos_head.compute_loss (focal/IoU/BCE losses) is an injected dependency.
    # TODO(synk): score-threshold top-k selection and batched NMS are data-dependent
    # (dynamic shapes) and are not implemented as Pallas kernels.
    # TODO(synk): PSRoIHead (re-id branch) is an injected dependency and is skipped.

    jax.block_until_ready((matched_idxs, cls_logits, bbox_regression, centerness,
                           boxes, scores))

    # --- correctness checks against pure-JAX references ---
    hp = jax.lax.Precision.HIGHEST
    x_pm = jnp.swapaxes(x_t, 1, 2)                                        # (B, P, Cin)
    feat_ref = jnp.maximum(jnp.matmul(x_pm, w_feat, precision=hp) + b_feat, 0.0)
    cls_ref = jnp.matmul(feat_ref, w_cls, precision=hp) + b_cls
    reg_ref = jnp.matmul(feat_ref, w_reg, precision=hp) + b_reg
    ctr_ref = jnp.matmul(feat_ref, w_ctr, precision=hp) + b_ctr
    # head matmul runs with bf16 operands (f32 accumulation) -> slightly looser tol
    assert bool(jnp.allclose(cls_ref, cls_logits, atol=2e-2, rtol=1e-2)), "cls mismatch"
    assert bool(jnp.allclose(reg_ref, bbox_regression, atol=2e-2, rtol=1e-2)), "reg mismatch"
    assert bool(jnp.allclose(ctr_ref, centerness, atol=2e-2, rtol=1e-2)), "ctr mismatch"

    ref_boxes = jnp.stack([_decode_ref(bbox_regression[b], points, (IMG_H, IMG_W))
                           for b in range(B)])
    assert bool(jnp.allclose(ref_boxes, boxes, atol=5e-2, rtol=1e-3)), "decode mismatch"

    ref_scores = jax.nn.sigmoid(cls_logits) * jax.nn.sigmoid(centerness)
    assert bool(jnp.allclose(ref_scores, scores, atol=1e-3, rtol=1e-3)), "score mismatch"

    ref_match = jnp.stack([_match_ref_one(points, limits, gt_boxes[b]) for b in range(B)])
    assert bool(jnp.all(ref_match == matched_idxs)), "matching mismatch"

    print("KERNEL_OK")
</pallas_src>

<mosaic_0001>
module attributes {stable_mosaic.version = 11 : i64} {
  func.func @_fused_fwd_kernel(%arg0: i32, %arg1: i32, %arg2: memref<1x3x256xf32, #tpu.memory_space<vmem>>, %arg3: memref<16x3xf32, #tpu.memory_space<vmem>>, %arg4: memref<16x1xf32, #tpu.memory_space<vmem>>, %arg5: memref<8x16xf32, #tpu.memory_space<vmem>>, %arg6: memref<8x1xf32, #tpu.memory_space<vmem>>, %arg7: memref<2x256xf32, #tpu.memory_space<vmem>>, %arg8: memref<1x8x256xf32, #tpu.memory_space<vmem>>, %arg9: memref<1x8x256xf32, #tpu.memory_space<vmem>>) attributes {dimension_semantics = [#tpu.dimension_semantics<parallel>, #tpu.dimension_semantics<parallel>], iteration_bounds = array<i64: 2, 1>, scalar_prefetch = 0 : i64, scratch_operands = 0 : i64, tpu.core_type = #tpu.core_type<tc>, window_params = [{transform_indices = @transform_0, window_bounds = array<i64: 1, 3, 256>}, {pipeline_mode = #tpu.pipeline_mode<synchronous>, transform_indices = @transform_1, window_bounds = array<i64: 16, 3>}, {pipeline_mode = #tpu.pipeline_mode<synchronous>, transform_indices = @transform_2, window_bounds = array<i64: 16, 1>}, {pipeline_mode = #tpu.pipeline_mode<synchronous>, transform_indices = @transform_3, window_bounds = array<i64: 8, 16>}, {pipeline_mode = #tpu.pipeline_mode<synchronous>, transform_indices = @transform_4, window_bounds = array<i64: 8, 1>}, {transform_indices = @transform_5, window_bounds = array<i64: 2, 256>}, {transform_indices = @transform_6, window_bounds = array<i64: 1, 8, 256>}, {transform_indices = @transform_7, window_bounds = array<i64: 1, 8, 256>}]} {
    %c0 = arith.constant 0 : index
    %c0_0 = arith.constant 0 : index
    %c0_1 = arith.constant 0 : index
    %0 = vector.load %arg2[%c0, %c0_0, %c0_1] : memref<1x3x256xf32, #tpu.memory_space<vmem>>, vector<1x3x256xf32>
    %1 = vector.shape_cast %0 : vector<1x3x256xf32> to vector<3x256xf32>
    %c0_2 = arith.constant 0 : index
    %c0_3 = arith.constant 0 : index
    %2 = vector.load %arg3[%c0_2, %c0_3] : memref<16x3xf32, #tpu.memory_space<vmem>>, vector<16x3xf32>
    %3 = vector.extract_strided_slice %2 {offsets = [0, 0], sizes = [16, 1], strides = [1, 1]} : vector<16x3xf32> to vector<16x1xf32>
    %4 = vector.extract_strided_slice %1 {offsets = [0, 0], sizes = [1, 256], strides = [1, 1]} : vector<3x256xf32> to vector<1x256xf32>
    %5 = vector.broadcast %3 : vector<16x1xf32> to vector<16x256xf32>
    %6 = vector.broadcast %4 : vector<1x256xf32> to vector<16x256xf32>
    %7 = arith.mulf %5, %6 : vector<16x256xf32>
    %8 = vector.extract_strided_slice %2 {offsets = [0, 1], sizes = [16, 1], strides = [1, 1]} : vector<16x3xf32> to vector<16x1xf32>
    %9 = vector.extract_strided_slice %1 {offsets = [1, 0], sizes = [1, 256], strides = [1, 1]} : vector<3x256xf32> to vector<1x256xf32>
    %10 = vector.broadcast %8 : vector<16x1xf32> to vector<16x256xf32>
    %11 = vector.broadcast %9 : vector<1x256xf32> to vector<16x256xf32>
    %12 = arith.mulf %10, %11 : vector<16x256xf32>
    %13 = arith.addf %7, %12 : vector<16x256xf32>
    %14 = vector.extract_strided_slice %2 {offsets = [0, 2], sizes = [16, 1], strides = [1, 1]} : vector<16x3xf32> to vector<16x1xf32>
    %15 = vector.extract_strided_slice %1 {offsets = [2, 0], sizes = [1, 256], strides = [1, 1]} : vector<3x256xf32> to vector<1x256xf32>
    %16 = vector.broadcast %14 : vector<16x1xf32> to vector<16x256xf32>
    %17 = vector.broadcast %15 : vector<1x256xf32> to vector<16x256xf32>
    %18 = arith.mulf %16, %17 : vector<16x256xf32>
    %19 = arith.addf %13, %18 : vector<16x256xf32>
    %c0_4 = arith.constant 0 : index
    %c0_5 = arith.constant 0 : index
    %20 = vector.load %arg4[%c0_4, %c0_5] : memref<16x1xf32, #tpu.memory_space<vmem>>, vector<16x1xf32>
    %21 = vector.broadcast %20 : vector<16x1xf32> to vector<16x256xf32>
    %22 = arith.addf %19, %21 : vector<16x256xf32>
    %cst = arith.constant 0.000000e+00 : f32
    %23 = vector.broadcast %cst : f32 to vector<16x256xf32>
    %24 = arith.maximumf %22, %23 : vector<16x256xf32>
    %c0_6 = arith.constant 0 : index
    %c0_7 = arith.constant 0 : index
    %25 = vector.load %arg5[%c0_6, %c0_7] : memref<8x16xf32, #tpu.memory_space<vmem>>, vector<8x16xf32>
    %26 = arith.truncf %25 : vector<8x16xf32> to vector<8x16xbf16>
    %27 = arith.truncf %24 : vector<16x256xf32> to vector<16x256xbf16>
    %cst_8 = arith.constant dense<0.000000e+00> : vector<8x256xf32>
    %28 = tpu.matmul %26, %27, %cst_8 {dimension_numbers = #tpu.dot_dimension_numbers<[1], [0], [0], [1], [0, 0, 1, 1], [], []>} : vector<8x16xbf16>, vector<16x256xbf16>, vector<8x256xf32> -> vector<8x256xf32>
    %c0_9 = arith.constant 0 : index
    %c0_10 = arith.constant 0 : index
    %29 = vector.load %arg6[%c0_9, %c0_10] : memref<8x1xf32, #tpu.memory_space<vmem>>, vector<8x1xf32>
    %30 = vector.broadcast %29 : vector<8x1xf32> to vector<8x256xf32>
    %31 = arith.addf %28, %30 : vector<8x256xf32>
    %c0_11 = arith.constant 0 : index
    %c0_12 = arith.constant 0 : index
    %c0_13 = arith.constant 0 : index
    %32 = vector.load %arg8[%c0_11, %c0_12, %c0_13] : memref<1x8x256xf32, #tpu.memory_space<vmem>>, vector<1x8x256xf32>
    %33 = vector.shape_cast %32 : vector<1x8x256xf32> to vector<8x256xf32>
    %34 = vector.shape_cast %31 : vector<8x256xf32> to vector<1x8x256xf32>
    tpu.vector_store %arg8[%c0_11, %c0_12, %c0_13], %34 {strides = array<i32>} : memref<1x8x256xf32, #tpu.memory_space<vmem>>, vector<1x8x256xf32>,
    %35 = vector.extract_strided_slice %31 {offsets = [0, 0], sizes = [1, 256], strides = [1, 1]} : vector<8x256xf32> to vector<1x256xf32>
    %36 = vector.extract_strided_slice %31 {offsets = [1, 0], sizes = [4, 256], strides = [1, 1]} : vector<8x256xf32> to vector<4x256xf32>
    %37 = vector.extract_strided_slice %31 {offsets = [5, 0], sizes = [1, 256], strides = [1, 1]} : vector<8x256xf32> to vector<1x256xf32>
    %c0_14 = arith.constant 0 : index
    %c0_15 = arith.constant 0 : index
    %38 = vector.load %arg7[%c0_14, %c0_15] : memref<2x256xf32, #tpu.memory_space<vmem>>, vector<1x256xf32>
    %c1 = arith.constant 1 : index
    %c0_16 = arith.constant 0 : index
    %39 = vector.load %arg7[%c1, %c0_16] : memref<2x256xf32, #tpu.memory_space<vmem>>, vector<1x256xf32>
    %cst_17 = arith.constant 4.13516665 : f32
    %40 = vector.broadcast %cst_17 : f32 to vector<4x256xf32>
    %41 = arith.minimumf %36, %40 : vector<4x256xf32>
    %42 = math.exp %41 : vector<4x256xf32>
    %43 = vector.extract_strided_slice %42 {offsets = [0, 0], sizes = [1, 256], strides = [1, 1]} : vector<4x256xf32> to vector<1x256xf32>
    %cst_18 = arith.constant 6.400000e+01 : f32
    %44 = vector.broadcast %cst_18 : f32 to vector<1x256xf32>
    %45 = arith.mulf %44, %43 : vector<1x256xf32>
    %46 = arith.subf %38, %45 : vector<1x256xf32>
    %47 = vector.extract_strided_slice %42 {offsets = [1, 0], sizes = [1, 256], strides = [1, 1]} : vector<4x256xf32> to vector<1x256xf32>
    %cst_19 = arith.constant 6.400000e+01 : f32
    %48 = vector.broadcast %cst_19 : f32 to vector<1x256xf32>
    %49 = arith.mulf %48, %47 : vector<1x256xf32>
    %50 = arith.subf %39, %49 : vector<1x256xf32>
    %51 = vector.extract_strided_slice %42 {offsets = [2, 0], sizes = [1, 256], strides = [1, 1]} : vector<4x256xf32> to vector<1x256xf32>
    %cst_20 = arith.constant 6.400000e+01 : f32
    %52 = vector.broadcast %cst_20 : f32 to vector<1x256xf32>
    %53 = arith.mulf %52, %51 : vector<1x256xf32>
    %54 = arith.addf %38, %53 : vector<1x256xf32>
    %55 = vector.extract_strided_slice %42 {offsets = [3, 0], sizes = [1, 256], strides = [1, 1]} : vector<4x256xf32> to vector<1x256xf32>
    %cst_21 = arith.constant 6.400000e+01 : f32
    %56 = vector.broadcast %cst_21 : f32 to vector<1x256xf32>
    %57 = arith.mulf %56, %55 : vector<1x256xf32>
    %58 = arith.addf %39, %57 : vector<1x256xf32>
    %59 = tpu.concatenate %46, %50, %54, %58 in 0 : vector<1x256xf32>, vector<1x256xf32>, vector<1x256xf32>, vector<1x256xf32> -> vector<4x256xf32>
    %60 = arith.negf %35 : vector<1x256xf32>
    %61 = math.exp %60 : vector<1x256xf32>
    %cst_22 = arith.constant 1.000000e+00 : f32
    %62 = vector.broadcast %cst_22 : f32 to vector<1x256xf32>
    %63 = arith.addf %62, %61 : vector<1x256xf32>
    %64 = arith.divf %62, %63 : vector<1x256xf32>
    %65 = arith.negf %37 : vector<1x256xf32>
    %66 = math.exp %65 : vector<1x256xf32>
    %cst_23 = arith.constant 1.000000e+00 : f32
    %67 = vector.broadcast %cst_23 : f32 to vector<1x256xf32>
    %68 = arith.addf %67, %66 : vector<1x256xf32>
    %69 = arith.divf %67, %68 : vector<1x256xf32>
    %70 = arith.mulf %64, %69 : vector<1x256xf32>
    %71 = tpu.concatenate %59, %70 in 0 : vector<4x256xf32>, vector<1x256xf32> -> vector<5x256xf32>
    %cst_24 = arith.constant 0.000000e+00 : f32
    %72 = vector.broadcast %cst_24 : f32 to vector<3x256xf32>
    %73 = tpu.concatenate %71, %72 in 0 : vector<5x256xf32>, vector<3x256xf32> -> vector<8x256xf32>
    %c0_25 = arith.constant 0 : index
    %c0_26 = arith.constant 0 : index
    %c0_27 = arith.constant 0 : index
    %74 = vector.load %arg9[%c0_25, %c0_26, %c0_27] : memref<1x8x256xf32, #tpu.memory_space<vmem>>, vector<1x8x256xf32>
    %75 = vector.shape_cast %74 : vector<1x8x256xf32> to vector<8x256xf32>
    %76 = vector.shape_cast %73 : vector<8x256xf32> to vector<1x8x256xf32>
    tpu.vector_store %arg9[%c0_25, %c0_26, %c0_27], %76 {strides = array<i32>} : memref<1x8x256xf32, #tpu.memory_space<vmem>>, vector<1x8x256xf32>,
    return
  }
  func.func @transform_0(%arg0: i32, %arg1: i32) -> (i32, i32, i32) {
    %c0_i32 = arith.constant 0 : i32
    %c0_i32_0 = arith.constant 0 : i32
    return %arg0, %c0_i32, %arg1 : i32, i32, i32
  }
  func.func @transform_1(%arg0: i32, %arg1: i32) -> (i32, i32) {
    %c0_i32 = arith.constant 0 : i32
    %c0_i32_0 = arith.constant 0 : i32
    %c0_i32_1 = arith.constant 0 : i32
    return %c0_i32, %c0_i32_0 : i32, i32
  }
  func.func @transform_2(%arg0: i32, %arg1: i32) -> (i32, i32) {
    %c0_i32 = arith.constant 0 : i32
    %c0_i32_0 = arith.constant 0 : i32
    %c0_i32_1 = arith.constant 0 : i32
    return %c0_i32, %c0_i32_0 : i32, i32
  }
  func.func @transform_3(%arg0: i32, %arg1: i32) -> (i32, i32) {
    %c0_i32 = arith.constant 0 : i32
    %c0_i32_0 = arith.constant 0 : i32
    %c0_i32_1 = arith.constant 0 : i32
    return %c0_i32, %c0_i32_0 : i32, i32
  }
  func.func @transform_4(%arg0: i32, %arg1: i32) -> (i32, i32) {
    %c0_i32 = arith.constant 0 : i32
    %c0_i32_0 = arith.constant 0 : i32
    %c0_i32_1 = arith.constant 0 : i32
    return %c0_i32, %c0_i32_0 : i32, i32
  }
  func.func @transform_5(%arg0: i32, %arg1: i32) -> (i32, i32) {
    %c0_i32 = arith.constant 0 : i32
    %c0_i32_0 = arith.constant 0 : i32
    return %c0_i32, %arg1 : i32, i32
  }
  func.func @transform_6(%arg0: i32, %arg1: i32) -> (i32, i32, i32) {
    %c0_i32 = arith.constant 0 : i32
    %c0_i32_0 = arith.constant 0 : i32
    return %arg0, %c0_i32, %arg1 : i32, i32, i32
  }
  func.func @transform_7(%arg0: i32, %arg1: i32) -> (i32, i32, i32) {
    %c0_i32 = arith.constant 0 : i32
    %c0_i32_0 = arith.constant 0 : i32
    return %arg0, %c0_i32, %arg1 : i32, i32, i32
  }
}

</mosaic_0001>

<bundles_post_ra>
// kernel: tpu_custom_call.1
= control target key start
LH: loop header
LB: loop body
LE: loop exit
PB: predicated region body
PF: predicated region fallthrough
CT: control target
= control target key end

     0   :  { %13 = vsyncpa [#allocation3], 0  ;;  %s1313_s0 = inlined_call_operand.vmem [shape: f32[2,3,256], index: 0, kind: input, shape index: {}]   ;;  %s1314_s1 = inlined_call_operand.vmem [shape: f32[16,3], index: 1, kind: input, shape index: {}]   ;;  %s1315_s2 = inlined_call_operand.vmem [shape: f32[16,1], index: 2, kind: input, shape index: {}]   ;;  %s1316_s3 = inlined_call_operand.vmem [shape: f32[8,16], index: 3, kind: input, shape index: {}]   ;;  %s1317_s4 = inlined_call_operand.vmem [shape: f32[8,1], index: 4, kind: input, shape index: {}]   ;;  %s1318_s5 = inlined_call_operand.vmem [shape: f32[2,256], index: 5, kind: input, shape index: {}]   ;;  %s1319_s6 = inlined_call_operand.hbm [shape: f32[2,8,256], index: 6, kind: output, shape index: {0}]   ;;  %s1320_s7 = inlined_call_operand.hbm [shape: f32[2,8,256], index: 7, kind: output, shape index: {1}]  }
   0x1   :  { %15 = vsyncpa [#allocation3 + $0x1], 0 }
   0x2   :  { %16 = vsyncpa [#allocation5], 0 }
   0x3   :  { %18 = vsyncpa [#allocation5 + $0x1], 0  ;;  %s1103_s24 = smov 0   ;;  %s1105_s25 = smov 0  }
   0x4   :  { %s1107_s26 = smov 0   ;;  %s1109_s27 = smov 0  }
   0x5   :  { %s1111_s28 = smov 0   ;;  %s1113_s29 = smov 0  }
   0x6 LB: > { %s838_s30 = sadd.s32 4294967295, %s1055_s29   ;;  %s839_s8 = sadd.s32 4294967294, %s1055_s29   ;;  %s1055_s29 = sphi %s1113_s29, %s24_s29   ;;  %s1051_s28 = sphi %s1111_s28, %s1329_s28   ;;  %s1047_s27 = sphi %s1109_s27, %s1328_s27   ;;  %s1043_s26 = sphi %s1107_s26, %s1327_s26   ;;  %s1039_s25 = sphi %s1105_s25, %s1326_s25   ;;  %s1035_s24 = sphi %s1103_s24, %s1325_s24  }
   0x7   : > { %s36_s9 = sadd.s32 1, %s1051_s28  ;;  %s183_s10 = sadd.s32 1, %s1043_s26 }
   0x8   : > { %p38_p0 = scmp.ge.s32.totalorder %s36_s9, 2  ;;  %p193_p1 = scmp.ne.s32.totalorder %s1043_s26, %s1039_s25 }
   0x9   : > { %p194_p2 = scmp.eq.s32.totalorder %s838_s30, 1  ;;  %p199_p3 = scmp.ne.s32.totalorder %s1039_s25, %s1035_s24 }
   0xa   : > { %s1331_s9 = smov (%p38_p0, %s36_s9), 0  ;;  %p200_p5 = scmp.eq.s32.totalorder %s839_s8, 1 }
   0xb   : > { %p1143_p4 = por %p194_p2, %p193_p1  ;;  %s178_s12 = ssub.s32 %s1051_s28, %s1331_s9 }
   0xc   : > { %p843_p6 = scmp.ge.s32.totalorder %s1055_s29, 1  ;;  %p181_p7 = scmp.eq.s32.totalorder %s178_s12, 0 }
   0xd   : > { %p1150_p8 = por %p200_p5, %p199_p3  ;;  %p280_p9 = scmp.lt.s32.totalorder %s1055_s29, 3 }
   0xe   : > { %s1156_s14 = scalar_select %p181_p7, %s1043_s26, %s183_s10  }
   0xf   : > { %p281_p10 = pnand %p843_p6, %p280_p9 }
  0x10   : > { %v346_v0 = vld [vmem:[%s1314_s1] sm:$0xff] (!%p281_p10)  ;;  %v1057_v1 = vmov (!%p281_p10), 1   ;;  %v1058_v2 = vmov (!%p281_p10), 0   ;;  %v347_v3 = vld [vmem:[%s1314_s1 + $0x8] sm:$0xff] (!%p281_p10)  ;;  %v1059_v4 = vmov (!%p281_p10), 2   ;;  %p327_p11 = scmp.lt.s32.totalorder (!%p281_p10), %s1047_s27, 1  ;;  %v359_v8 = vlaneseq (!%p281_p10) }
  0x11   : > { %284 = sbr.rel (%p281_p10) target bundleno = 446 (0x1be), region = 44  ;;  %928 = vset.pattern.permute.xlu1 (!%p281_p10), %v1057_v1  ;;  %927 = vset.pattern.permute.xlu0 (!%p281_p10), %v1058_v2  ;;  %v449_v5 = vld [vmem:[%s1315_s2] sm:$0xff] (!%p281_p10)  ;;  %v450_v6 = vld [vmem:[%s1315_s2 + $0x8] sm:$0xff] (!%p281_p10)  ;;  %vm479_vm0 = vcmask (!%p281_p10), 130048   ;;  %s1200_s19 = sand.u32 (!%p281_p10), 1, %s1039_s25  }
  0x12   : > { %382 = vperm.xlu1 (!%p281_p10), %928, %v346_v0   ;;  %350 = vperm.xlu0 (!%p281_p10), %927, %v346_v0   ;;  %v473_v7 = vld [vmem:[%s1317_s4] sm:$0xff] (!%p281_p10)  ;;  %v1175_v9 = vshrl.u32 (!%p281_p10), %v359_v8, 7  ;;  %s844_s20 = sshll.u32 (!%p281_p10), %s1200_s19, 4  ;;  %s1321_s21 = sshll.u32 (!%p281_p10), %s1047_s27, 8 }
  0x13   : > { %515 = vmatprep.mubr.bf16.mxu0 (!%p281_p10), %v1058_v2  ;;  %v469_v1 = vld [vmem:[%s1316_s3] sm:$0xff] (!%p281_p10)  ;;  %s318_s22 = scalar_lea.vmem (!%p281_p10), [#allocation2], %s844_s20  ;;  %s675_s12 = scalar_lea.sflag (!%p281_p10), [#allocation3], %s1200_s19 }
  0x14   : > { %v1181_v10 = vsub.s32 (!%p281_p10), 1, %v1175_v9  ;;  %v395_v11 = vsub.s32 (!%p281_p10), 5, %v1175_v9  ;;  %v1185_v12 = vsub.s32 (!%p281_p10), 0, %v1175_v9  ;;  %v365_v13 = vsub.s32 (!%p281_p10), 4, %v1175_v9  ;;  %s696_s23 = sshll.u32 (!%p281_p10), %s318_s22, 4  ;;  %s1213_s23 = int_to_ptr.vmem [resolvable:$true] %s696_s23 }
  0x15   : > { %v425_v19 = vsub.s32 (!%p281_p10), 2, %v1175_v9  ;;  %v429_v20 = vsub.s32 (!%p281_p10), 6, %v1175_v9  ;;  %s945_s15 = scalar_lea.vmem (!%p281_p10), %s1213_s23, 256 }
  0x16   : > { %386 = vperm.xlu1 (!%p281_p10), %928, %v347_v3   ;;  %355 = vperm.xlu0 (!%p281_p10), %927, %v347_v3   ;;  %p946_p12 = scmp.ne.s32.totalorder (!%p281_p10), %s1213_s23, %s945_s15 }
  0x18   : > { %s328_s8 = scalar_select %p327_p11, %s1047_s27, 1 }
  0x19   : > { %p947_p13 = pnand %p946_p12, %p1143_p4 }
  0x1a   : > { %930 = vset.pattern.permute.xlu1 %v1059_v4  ;;  %929 = vset.pattern.permute.xlu0 %v1059_v4  ;;  %s860_s10 = sshll.u32 %s328_s8, 3  ;;  %v470_v4 = vpack.c.bf16 %v469_v1, %v469_v1 }
  0x1b   : > { %420 = vperm.xlu1 %930, %v347_v3   ;;  %416 = vperm.xlu0 %929, %v346_v0   ;;  %s334_s16 = scalar_lea.vmem %s1313_s0, %s860_s10  ;;  %s1211_s10 = scalar_lea.hbm %s1319_s6, %s1321_s21 }
  0x1c   : > { %v345_v14 = vld [vmem:[%s334_s16] sm:$0x77]  ;;  %p948_p0 = pneg %p947_p13  ;;  %s1060_s16 = smov [#allocation2]  }
  0x1d   : > { %v392_v15 = vrot.slane %v345_v14, %v1181_v10  ;;  %v396_v16 = vrot.slane %v345_v14, %v395_v11  ;;  %v362_v17 = vrot.slane %v345_v14, %v1185_v12  ;;  %v366_v18 = vrot.slane %v345_v14, %v365_v13  ;;  %s949_s17 = sshll.u32 %s1060_s16, 4  ;;  %s950_s17 = int_to_ptr.vmem [resolvable:$false] %s949_s17 }
  0x1e   : > { %v426_v27 = vrot.slane %v345_v14, %v425_v19  ;;  %v430_v28 = vrot.slane %v345_v14, %v429_v20  ;;  %s951_s18 = scalar_lea.vmem %s950_s17, 512  ;;  %p952_p1 = scmp.lt.s32.totalorder %s1213_s23, %s950_s17 }
  0x1f   : > { %931 = vset.pattern.permute.xlu1 %v1058_v2  ;;  %932 = vset.pattern.permute.xlu0 %v1058_v2  ;;  %v402_v22 = vrot.slane %v392_v15, %v1181_v10  ;;  %v406_v23 = vrot.slane %v396_v16, %v1181_v10  ;;  %v372_v25 = vrot.slane %v362_v17, %v1185_v12  ;;  %p953_p2 = scmp.lt.s32.totalorder %s951_s18, %s945_s15 }
  0x20   : > { %453 = vperm.xlu1 %931, %v449_v5   ;;  %458 = vperm.xlu0 %932, %v450_v6   ;;  %v376_v26 = vrot.slane %v366_v18, %v1185_v12  ;;  %v436_v39 = vrot.slane %v426_v27, %v425_v19  ;;  %v440_v40 = vrot.slane %v430_v28, %v425_v19 }
  0x21   : > { %p954_p3 = por %p953_p2, %p952_p1 }
  0x23   : > { %p955_p5 = pnand %p954_p3, %p948_p0 }
  0x24   : > { %476 = vperm.xlu1 %931, %v473_v7  }
  0x91   : > { %v383_v21 = vpop.permute.xlu1 %382  ;;  %v351_v24 = vpop.permute.xlu0 %350 }
  0x92   : > { %v407_v29 = vmul.f32 %v402_v22, %v383_v21  ;;  %v408_v30 = vmul.f32 %v406_v23, %v383_v21  ;;  %v377_v31 = vmul.f32 %v372_v25, %v351_v24  ;;  %v378_v32 = vmul.f32 %v376_v26, %v351_v24 }
  0x94   : > { %v411_v41 = vadd.f32 %v407_v29, %v377_v31  ;;  %v412_v42 = vadd.f32 %v408_v30, %v378_v32 }
  0x95   : > { %v387_v33 = vpop.permute.xlu1 %386  ;;  %v356_v34 = vpop.permute.xlu0 %355 }
  0x96   : > { %v409_v35 = vmul.f32 %v402_v22, %v387_v33  ;;  %v410_v36 = vmul.f32 %v406_v23, %v387_v33  ;;  %v379_v37 = vmul.f32 %v372_v25, %v356_v34  ;;  %v380_v38 = vmul.f32 %v376_v26, %v356_v34 }
  0x98   : > { %v413_v43 = vadd.f32 %v409_v35, %v379_v37  ;;  %v414_v44 = vadd.f32 %v410_v36, %v380_v38 }
  0x9a   : > { %v421_v45 = vpop.permute.xlu1 %420  ;;  %v417_v46 = vpop.permute.xlu0 %416 }
  0x9b   : > { %v443_v47 = vmul.f32 %v436_v39, %v421_v45  ;;  %v444_v48 = vmul.f32 %v440_v40, %v421_v45  ;;  %v441_v49 = vmul.f32 %v436_v39, %v417_v46  ;;  %v442_v50 = vmul.f32 %v440_v40, %v417_v46 }
  0x9d   : > { %v445_v51 = vadd.f32 %v441_v49, %v411_v41  ;;  %v446_v52 = vadd.f32 %v442_v50, %v412_v42  ;;  %v447_v53 = vadd.f32 %v443_v47, %v413_v43  ;;  %v448_v54 = vadd.f32 %v444_v48, %v414_v44 }
  0x9f   : > { %v454_v55 = vpop.permute.xlu1 %453  ;;  %v459_v56 = vpop.permute.xlu0 %458 }
  0xa0   : > { %v461_v57 = vadd.f32 %v454_v55, %v445_v51  ;;  %v462_v58 = vadd.f32 %v454_v55, %v446_v52  ;;  %v463_v59 = vadd.f32 %v459_v56, %v447_v53  ;;  %v464_v60 = vadd.f32 %v459_v56, %v448_v54 }
  0xa2   : > { %v465_v61 = vmax.f32 %v461_v57, 0.0  ;;  %v467_v62 = vmax.f32 %v463_v59, 0.0  ;;  %v468_v63 = vmax.f32 %v464_v60, 0.0  ;;  %v466_v0 = vmax.f32 %v462_v58, 0.0 }
  0xa3   : > { %v477_v5 = vpop.permute.xlu1 %476 }
  0xa4   : > { %v472_v2 = vpack.c.bf16 %v468_v63, %v466_v0  ;;  %v471_v3 = vpack.c.bf16 %v467_v62, %v465_v61 }
  0xa6   : > { %483 = vmatprep.subr.bf16.mxu0 %v472_v2 }
  0xa7   : > { %484 = vmatpush1.bf16.msra.mxu0 %v471_v3 }
  0xaa   : > { %848 = vmatmul.mubr.msk.bf16.vlgmr.msra.gmra.mrb[0].mxu0 %vm479_vm0, %v470_v4 }
 0x17d   : > { %v517_v6 = vpop.f32.mrb[0].mxu0 }
 0x17e   : > { %v518_v7 = vadd.f32 %v517_v6, %v477_v5  ;;  %v519_v8 = vpop.f32.mrb[1].mxu0 }
 0x17f   : > { %v520_v11 = vadd.f32 %v519_v8, %v477_v5  ;;  %v521_v13 = vpop.f32.mrb[2].mxu0 }
 0x180   : > { %524 = vst [vmem:[%s318_s22] sm:$0xff] %v518_v7  ;;  %v529_v14 = vmin.f32 %v518_v7, 4.1351666  ;;  %v850_v15 = vmul.f32 -1.442695, %v518_v7  ;;  %v522_v16 = vpop.f32.mrb[3].mxu0 }
 0x181   : > { %525 = vst [vmem:[%s318_s22 + $0x8] sm:$0xff] %v520_v11  ;;  %v530_v17 = vmin.f32 %v520_v11, 4.1351666  ;;  %v851_v18 = vmul.f32 -1.442695, %v520_v11 }
 0x182   : > { %v531_v19 = vmul.f32 1.442695, %v529_v14  ;;  %933 = vpow2.f32 %v850_v15 }
 0x183   : > { %958 = shalt.err (!%p955_p5)
}
 0x184   : > { %s959_s22 = scalar_lea.hbm %s1211_s10, 256  ;;  %s963_s16 = scalar_lea.hbm %s1319_s6, 512 }
 0x185   : > { %p960_p6 = scmp.ne.s32.totalorder %s1211_s10, %s959_s22  ;;  %p964_p10 = scmp.lt.u32.totalorder %s1211_s10, %s1319_s6 }
 0x186   : > { %p965_p11 = scmp.lt.u32.totalorder %s963_s16, %s959_s22  ;;  %p967_p13 = scmp.lt.u32.totalorder %s959_s22, %s1211_s10 }
 0x187   : > { %p961_p7 = pnand %p960_p6, %p1143_p4 }
 0x188   : > { %p966_p12 = por %p965_p11, %p964_p10 }
 0x189   : > { %p962_p9 = pneg %p961_p7 }
 0x18a   : > { %p968_p0 = por %p967_p13, %p966_p12 }
 0x18c   : > { %p969_p1 = pnand %p968_p0, %p962_p9 }
 0x18e   : > { %972 = shalt.err (!%p969_p1)
}
 0x18f   : > { %863 = dma.vmem_to_hbm [thread:$0]  (%p1143_p4), %s1213_s23, 256, %s1211_s10, %s675_s12   ;;  %v533_v20 = vmul.f32 1.442695, %v530_v17  ;;  %935 = vpow2.f32 %v851_v18  ;;  %v1061_v21 = vmov 1966171168   ;;  %v934_v23 = vpop.eup %933  ;;  %vm631_vm1 = vcmask 1040384  }
 0x190   : > { %937 = vpow2.f32 %v531_v19  ;;  %v541_v22 = vunpack.c.l.s4 %v1061_v21  ;;  %v646_v26 = vadd.f32 1.0, %v934_v23  ;;  %v526_v39 = vld [vmem:[%s1318_s5] ss:$2 sm:$0x3]  ;;  %vm634_vm2 = vcmask 1041408   ;;  %s325_s15 = scalar_lea.vmem [#allocation4], %s844_s20 }
 0x191   : > { %939 = vpow2.f32 %v533_v20  ;;  %v849_v41 = vld [vmem:[%s1318_s5 + $0x1] ss:$2 sm:$0x3]  ;;  %vm637_vm3 = vcmask 1042432   ;;  %vm666_vm4 = vcmask 1043456   ;;  %s712_s18 = sshll.u32 %s325_s15, 4  ;;  %s1267_s18 = int_to_ptr.vmem [resolvable:$true] %s712_s18 }
 0x192   : > { %v542_v24 = vunpack.c.0.s8 %v541_v22  ;;  %941 = vrcp.f32 %v646_v26  ;;  %vm669_vm5 = vcmask 1044480   ;;  %s1324_s22 = sshll.u32 %s1047_s27, 8  ;;  %s680_s16 = scalar_lea.sflag [#allocation5], %s1200_s19 }
 0x193   : > { %s1265_s20 = scalar_lea.hbm %s1320_s7, %s1324_s22  ;;  %s973_s17 = scalar_lea.vmem %s1267_s18, 256 }
 0x194   : > { %v545_v32 = vsub.s32 %v542_v24, %v1175_v9  ;;  %p974_p2 = scmp.ne.s32.totalorder %s1267_s18, %s973_s17  ;;  %s1062_s27 = smov [#allocation4]  }
 0x195   : > { %s977_s21 = sshll.u32 %s1062_s27, 4  ;;  %s978_s21 = int_to_ptr.vmem [resolvable:$false] %s977_s21 }
 0x196   : > { %p975_p3 = pnand %p974_p2, %p1143_p4  ;;  %s979_s23 = scalar_lea.vmem %s978_s21, 512 }
 0x197   : > { %p980_p6 = scmp.lt.s32.totalorder %s1267_s18, %s978_s21  ;;  %p981_p7 = scmp.lt.s32.totalorder %s979_s23, %s973_s17 }
 0x198   : > { %p976_p5 = pneg %p975_p3 }
 0x199   : > { %v936_v25 = vpop.eup %935  ;;  %p982_p9 = por %p981_p7, %p980_p6 }
 0x19a   : > { %v938_v27 = vpop.eup %937  ;;  %v647_v28 = vadd.f32 1.0, %v936_v25 }
 0x19b   : > { %v940_v29 = vpop.eup %939  ;;  %v535_v30 = vmul.f32 64.0, %v938_v27  ;;  %p983_p10 = pnand %p982_p9, %p976_p5 }
 0x19c   : > { %v536_v31 = vmul.f32 64.0, %v940_v29  ;;  %943 = vrcp.f32 %v647_v28  ;;  %v942_v44 = vpop.eup %941 }
 0x19d   : > { %v654_v49 = vrot.slane %v942_v44, 5 }
 0x19e   : > { %v539_v33 = vcombine.low %v535_v30, %v536_v31  ;;  %v570_v34 = vcombine.high %v535_v30, %v536_v31 }
 0x19f   : > { %v658_v56 = vmul.f32 %v942_v44, %v654_v49 }
 0x1a0   : > { %v546_v35 = vrot.slane %v539_v33, %v545_v32  ;;  %v577_v36 = vrot.slane %v570_v34, %v545_v32 }
 0x1a1   : > { %v662_v3 = vrot.slane %v658_v56, 4 }
 0x1a2   : > { %v547_v37 = vcombine.high %v546_v35, %v546_v35  ;;  %v563_v38 = vrot.slane %v546_v35, %v545_v32  ;;  %v584_v40 = vrot.slane %v577_v36, %v545_v32 }
 0x1a4   : > { %v554_v42 = vrot.slane %v547_v37, %v545_v32  ;;  %v564_v43 = vcombine.high %v563_v38, %v563_v38  ;;  %v586_v48 = vadd.f32 %v849_v41, %v584_v40 }
 0x1a6   : > { %v944_v9 = vpop.eup %943  ;;  %v556_v45 = vsub.f32 %v526_v39, %v554_v42  ;;  %v566_v46 = vsub.f32 %v849_v41, %v564_v43  ;;  %v567_v47 = vcombine.high %v554_v42, %v554_v42  ;;  %v624_v61 = vrot.slane %v586_v48, %v1185_v12 }
 0x1a7   : > { %v655_v50 = vrot.slane %v944_v9, 5  ;;  %v628_v62 = vrot.slane %v586_v48, %v1181_v10 }
 0x1a8   : > { %v569_v51 = vadd.f32 %v567_v47, %v526_v39  ;;  %v591_v52 = vrot.slane %v556_v45, %v1185_v12  ;;  %v595_v53 = vrot.slane %v556_v45, %v1181_v10  ;;  %v602_v54 = vrot.slane %v566_v46, %v1185_v12 }
 0x1a9   : > { %v606_v55 = vrot.slane %v566_v46, %v1181_v10  ;;  %v659_v57 = vmul.f32 %v944_v9, %v655_v50 }
 0x1aa   : > { %v613_v58 = vrot.slane %v569_v51, %v1185_v12  ;;  %v617_v59 = vrot.slane %v569_v51, %v1181_v10  ;;  %v632_v60 = vsel %vm631_vm1, %v591_v52, %v602_v54 }
 0x1ab   : > { %v633_v63 = vsel %vm631_vm1, %v595_v53, %v606_v55  ;;  %v663_v0 = vrot.slane %v659_v57, 4 }
 0x1ac   : > { %v635_v1 = vsel %vm634_vm2, %v632_v60, %v613_v58  ;;  %v636_v2 = vsel %vm634_vm2, %v633_v63, %v617_v59 }
 0x1ad   : > { %v638_v4 = vsel %vm637_vm3, %v635_v1, %v624_v61  ;;  %v639_v12 = vsel %vm637_vm3, %v636_v2, %v628_v62 }
 0x1ae   : > { %v667_v5 = vsel %vm666_vm4, %v638_v4, %v662_v3  ;;  %v668_v10 = vsel %vm666_vm4, %v639_v12, %v663_v0 }
 0x1af   : > { %v670_v6 = vsel %vm669_vm5, %v667_v5, 0.0  ;;  %v671_v7 = vsel %vm669_vm5, %v668_v10, 0.0 }
 0x1b0   : > { %672 = vst [vmem:[%s325_s15] sm:$0xff] %v670_v6  ;;  %673 = vst [vmem:[%s325_s15 + $0x8] sm:$0xff] %v671_v7 }
 0x1b1   : > { %986 = shalt.err (!%p983_p10)
}
 0x1b2   : > { %s987_s19 = scalar_lea.hbm %s1265_s20, 256  ;;  %s991_s15 = scalar_lea.hbm %s1320_s7, 512 }
 0x1b3   : > { %p988_p11 = scmp.ne.s32.totalorder %s1265_s20, %s987_s19  ;;  %p992_p0 = scmp.lt.u32.totalorder %s1265_s20, %s1320_s7 }
 0x1b4   : > { %p993_p1 = scmp.lt.u32.totalorder %s991_s15, %s987_s19  ;;  %p995_p3 = scmp.lt.u32.totalorder %s987_s19, %s1265_s20 }
 0x1b5   : > { %p989_p12 = pnand %p988_p11, %p1143_p4 }
 0x1b6   : > { %p994_p2 = por %p993_p1, %p992_p0 }
 0x1b7   : > { %p990_p13 = pneg %p989_p12 }
 0x1b8   : > { %p996_p5 = por %p995_p3, %p994_p2 }
 0x1ba   : > { %p997_p6 = pnand %p996_p5, %p990_p13 }
 0x1bc   : > { %1000 = shalt.err (!%p997_p6)
}
 0x1bd   : > { %864 = dma.vmem_to_hbm [thread:$0]  (%p1143_p4), %s1267_s18, 256, %s1265_s20, %s680_s16  }
 0x1be PF: > { %p874_p7 = scmp.ge.s32.totalorder %s1055_s29, 2  ;;  %s724_s8 = sand.u32 1, %s1035_s24  }
 0x1bf   : > { %s725_s17 = scalar_lea.sflag [#allocation3], %s724_s8 }
 0x1c0   : > { %p868_p9 = pnand %p874_p7, %p1150_p8 }
 0x1c2   : > { %1026 = dma.done.wait (!%p868_p9), %s725_s17, 256  }
 0x1c3   : > { %1028 = vsyncadd (!%p868_p9), %s725_s17, 4294967040  ;;  %s734_s27 = scalar_lea.sflag [#allocation5], %s724_s8 }
 0x1c4   : > { %1030 = dma.done.wait (!%p868_p9), %s734_s27, 256  }
 0x1c5   : > { %1032 = vsyncadd (!%p868_p9), %s734_s27, 4294967040  ;;  %s24_s29 = sadd.s32 1, %s1055_s29   ;;  %s1325_s24 = smov %s1039_s25 }
 0x1c6   : > { %p21_p10 = scmp.ge.s32.totalorder %s24_s29, 4   ;;  %s1326_s25 = smov %s1043_s26 }
 0x1c7   : > { %s1327_s26 = smov %s1156_s14  ;;  %s1328_s27 = smov %s1051_s28 }
 0x1c8   : > { %s1329_s28 = smov %s1331_s9  ;;  %23 = sbr.rel (!%p21_p10) target bundleno = 6 (0x6), region = 100 }
 0x1cf   :  { %739 = vsyncpa [#allocation3], 1 }
 0x1d0   :  { %741 = vsyncpa [#allocation3 + $0x1], 1 }
 0x1d1   :  { %742 = vsyncpa [#allocation5], 1 }
 0x1d2   :  { %744 = vsyncpa [#allocation5 + $0x1], 1 }

</bundles_post_ra>
